<compile_context>
chip_gen: v7x
topology: tpu7x:2x2x1
jax: 0.10.0
libtpu: 0.0.40
codegen_flags: <defaults>
</compile_context>

<pallas_src>
import functools

import numpy as np
import jax
import jax.numpy as jnp
from jax.experimental import pallas as pl
from jax.experimental.pallas import tpu as pltpu


# --------------------------------------------------------------------------
# In-kernel helpers
# --------------------------------------------------------------------------
def _softplus_bce(z, target):
    """Stable BCEWithLogits terms: max(z,0) - t*z + log1p(exp(-|z|)); t is static."""
    sp = jnp.maximum(z, 0.0) + jnp.log1p(jnp.exp(-jnp.abs(z)))
    if target != 0.0:
        sp = sp - target * z
    return sp


def _rsum11(x2d):
    """Reduce a 2-D tile to (1, 1): lane reduce, then sublane reduce."""
    return jnp.sum(jnp.sum(x2d, axis=1, keepdims=True), axis=0, keepdims=True)


# --------------------------------------------------------------------------
# Pallas kernels
# --------------------------------------------------------------------------
def _bce_logits_kernel(d_ref, o_ref, *, target, scale, inv_count):
    """o = scale * mean(BCEWithLogits(d, target)) as a (1, 1) f32 tile."""
    z = d_ref[...].astype(jnp.float32)                 # cast in-kernel (native dtype in HBM)
    o_ref[...] = (scale * inv_count) * _rsum11(_softplus_bce(z, target))


def _gan_seg_stats_kernel(d_ref, p_ref, t_ref, stats_ref, adv_ref,
                          inter_acc, sump_acc, sumt_acc, l1_acc,
                          *, target, inv_d_count):
    """Streaming stats for the generator ('fake') loss.

    Grid = (split, kh):  axis 0 "parallel" (2-way TC split on v7x),
                         axis 1 "arbitrary" reduction over H tiles.
    d_ref     : (Nd, Md)      discriminator logits, resident across the grid
    p_ref     : (NC, TH, W)   predicted-mask tile   (native dtype)
    t_ref     : (NC, TH, W)   ground-truth tile     (native dtype)
    stats_ref : (1, NC, 4)    per-core partials [inter, sum_p, sum_t, l1]
    adv_ref   : (1, 1, 1)     mean BCEWithLogits over the logits
    *_acc     : (NC, 1) / f32 resident VMEM accumulators
    """
    k = pl.program_id(1)
    nk = pl.num_programs(1)

    @pl.when(k == 0)
    def _init():
        inter_acc[...] = jnp.zeros_like(inter_acc)
        sump_acc[...] = jnp.zeros_like(sump_acc)
        sumt_acc[...] = jnp.zeros_like(sumt_acc)
        l1_acc[...] = jnp.zeros_like(l1_acc)

    # Cast on vregs (in-kernel), accumulate in f32.
    p = p_ref[...].astype(jnp.float32)
    t = t_ref[...].astype(jnp.float32)
    # lane reduce (axis=2) then sublane reduce (axis=1)  ->  (NC, 1)
    inter_acc[...] += jnp.sum(jnp.sum(p * t, axis=2, keepdims=True), axis=1)
    sump_acc[...] += jnp.sum(jnp.sum(p, axis=2, keepdims=True), axis=1)
    sumt_acc[...] += jnp.sum(jnp.sum(t, axis=2, keepdims=True), axis=1)
    l1_acc[...] += jnp.sum(jnp.sum(jnp.abs(p - t), axis=2, keepdims=True), axis=1)

    @pl.when(k == nk - 1)
    def _finalize():
        # Adversarial BCE on the tiny resident logits block: computed once per
        # core (EUP work stays off the steady-state loop).
        z = d_ref[...].astype(jnp.float32)
        adv = _rsum11(_softplus_bce(z, target)) * inv_d_count       # (1, 1)
        adv_ref[...] = adv[None]                                    # (1, 1, 1)
        stats_ref[:, :, 0:1] = inter_acc[...][None]                 # (1, NC, 1)
        stats_ref[:, :, 1:2] = sump_acc[...][None]
        stats_ref[:, :, 2:3] = sumt_acc[...][None]
        stats_ref[:, :, 3:4] = l1_acc[...][None]


# --------------------------------------------------------------------------
# Tiling helper
# --------------------------------------------------------------------------
def _pick_tile_rows(h, bytes_per_row, budget_bytes=1 << 20):
    """Rows per H tile: multiple of 8 dividing h (or full h), ~budget-sized."""
    if h <= 8 or (h % 8) != 0:
        return h                                   # full-dim block bypasses (8,128) rule
    max_rows = max(8, budget_bytes // max(bytes_per_row, 1))
    th = max(8, min(h, (max_rows // 8) * 8))
    while h % th != 0:                             # h % 8 == 0 and th is a multiple of 8
        th -= 8
    return th


# --------------------------------------------------------------------------
# Wrapper (mirrors CombinedLoss.forward)
# --------------------------------------------------------------------------
@functools.partial(
    jax.jit,
    static_argnames=("real_or_fake", "lambda_gan", "lambda_dice",
                     "lambda_l1", "smooth", "tile_rows"))
def combined_loss(fake_outputs, fake_masks=None, real_masks=None,
                  real_or_fake="fake", lambda_gan=1.0, lambda_dice=50.0,
                  lambda_l1=10.0, smooth=1.0, tile_rows=None):
    """JAX/Pallas equivalent of CombinedLoss.forward."""
    d2 = fake_outputs.reshape(fake_outputs.shape[0], -1)   # native dtype; cast in kernel
    target = 1.0 if real_or_fake == "real" else 0.0
    d_bytes = d2.size * d2.dtype.itemsize

    # Discriminator 'real' step (spec returns adversarial loss only), or any
    # step without masks: BCE-only kernel on the tiny logits tensor.
    if real_or_fake == "real" or fake_masks is None or real_masks is None:
        scale = 1.0 if real_or_fake == "real" else float(lambda_gan)
        out = pl.pallas_call(
            functools.partial(_bce_logits_kernel, target=target,
                              scale=scale, inv_count=1.0 / d2.size),
            out_shape=jax.ShapeDtypeStruct((1, 1), jnp.float32),
            grid=(1,),
            in_specs=[pl.BlockSpec(d2.shape, lambda i: (0, 0))],
            out_specs=pl.BlockSpec((1, 1), lambda i: (0, 0)),
            compiler_params=pltpu.CompilerParams(
                dimension_semantics=("arbitrary",)),
            cost_estimate=pl.CostEstimate(
                flops=6 * d2.size, transcendentals=2 * d2.size,
                bytes_accessed=d_bytes + 4),
        )(d2)
        return out[0, 0]

    # Generator ('fake') step with masks: fused BCE + Dice/L1 statistics kernel.
    n, c, h, w = fake_masks.shape
    nc = n * c
    p3 = fake_masks.reshape(nc, h, w)                       # contiguous, free reshape
    t3 = real_masks.reshape(nc, h, w)
    itemsize = max(p3.dtype.itemsize, t3.dtype.itemsize)

    if tile_rows is None:
        th = _pick_tile_rows(h, nc * w * itemsize)          # ~1 MiB per operand per step
    else:
        th = int(tile_rows)
        assert h % th == 0 and (th == h or th % 8 == 0), "bad tile_rows"

    num_tiles = h // th
    split = 2 if (num_tiles % 2 == 0 and num_tiles >= 2) else 1   # 2-way TC split (v7x)
    kh = num_tiles // split

    mask_bytes = p3.size * p3.dtype.itemsize + t3.size * t3.dtype.itemsize

    kernel = functools.partial(_gan_seg_stats_kernel, target=target,
                               inv_d_count=1.0 / d2.size)

    stats, adv_out = pl.pallas_call(
        kernel,
        out_shape=(jax.ShapeDtypeStruct((split, nc, 4), jnp.float32),
                   jax.ShapeDtypeStruct((split, 1, 1), jnp.float32)),
        grid=(split, kh),
        in_specs=[
            pl.BlockSpec(d2.shape, lambda s, k: (0, 0)),                  # resident logits
            pl.BlockSpec((nc, th, w), lambda s, k: (0, s * kh + k, 0)),   # pred mask tile
            pl.BlockSpec((nc, th, w), lambda s, k: (0, s * kh + k, 0)),   # gt mask tile
        ],
        out_specs=(
            pl.BlockSpec((1, nc, 4), lambda s, k: (s, 0, 0)),
            pl.BlockSpec((1, 1, 1), lambda s, k: (s, 0, 0)),
        ),
        scratch_shapes=[pltpu.VMEM((nc, 1), jnp.float32)] * 4,
        compiler_params=pltpu.CompilerParams(
            dimension_semantics=("parallel", "arbitrary"),
            vmem_limit_bytes=32 * 1024 * 1024),
        cost_estimate=pl.CostEstimate(
            flops=10 * nc * h * w + 6 * d2.size,
            transcendentals=2 * d2.size,
            bytes_accessed=mask_bytes + d_bytes + (split * nc * 4 + split) * 4),
    )(d2, p3, t3)

    # Tiny XLA epilogue: combine per-core partials into the scalar loss.
    inter = jnp.sum(stats[:, :, 0], axis=0)                 # (NC,)
    sum_p = jnp.sum(stats[:, :, 1], axis=0)
    sum_t = jnp.sum(stats[:, :, 2], axis=0)
    l1_sum = jnp.sum(stats[:, :, 3])
    adv = adv_out[0, 0, 0]

    dice = (2.0 * inter + smooth) / (sum_p + sum_t + smooth)
    dice_loss = 1.0 - jnp.mean(dice)
    l1 = l1_sum * (1.0 / (nc * h * w))
    return lambda_gan * adv + lambda_dice * dice_loss + lambda_l1 * l1


# --------------------------------------------------------------------------
# Pure-JAX reference (same math as the PyTorch module), for validation
# --------------------------------------------------------------------------
def reference_loss(fake_outputs, fake_masks=None, real_masks=None,
                   real_or_fake="fake", lambda_gan=1.0, lambda_dice=50.0,
                   lambda_l1=10.0, smooth=1.0):
    x = fake_outputs.astype(jnp.float32)
    t = 1.0 if real_or_fake == "real" else 0.0
    adv = jnp.mean(jnp.maximum(x, 0.0) - x * t + jnp.log1p(jnp.exp(-jnp.abs(x))))
    if real_or_fake == "real":
        return adv
    if fake_masks is None or real_masks is None:
        return lambda_gan * adv
    p = fake_masks.astype(jnp.float32)
    q = real_masks.astype(jnp.float32)
    inter = jnp.sum(p * q, axis=(2, 3))
    union = jnp.sum(p, axis=(2, 3)) + jnp.sum(q, axis=(2, 3))
    dice = (2.0 * inter + smooth) / (union + smooth)
    dice_loss = 1.0 - jnp.mean(dice)
    l1 = jnp.mean(jnp.abs(p - q))
    return lambda_gan * adv + lambda_dice * dice_loss + lambda_l1 * l1


# --------------------------------------------------------------------------
if __name__ == "__main__":
    key = jax.random.PRNGKey(0)
    k1, k2, k3 = jax.random.split(key, 3)

    # Discriminator logits (patch-GAN style) and (N, C, H, W) masks.
    fake_outputs = jax.random.normal(k1, (2, 1, 4, 4), jnp.float32)
    fake_masks = jax.nn.sigmoid(jax.random.normal(k2, (2, 2, 32, 32), jnp.float32))
    real_masks = (jax.random.uniform(k3, (2, 2, 32, 32)) > 0.5).astype(jnp.float32)

    # Generator step (default tiling), forced multi-tile + 2-way split path,
    # bf16-mask path (exercises the in-kernel cast), and both D steps.
    g_loss = combined_loss(fake_outputs, fake_masks, real_masks, real_or_fake="fake")
    g_tiled = combined_loss(fake_outputs, fake_masks, real_masks,
                            real_or_fake="fake", tile_rows=8)
    g_bf16 = combined_loss(fake_outputs, fake_masks.astype(jnp.bfloat16),
                           real_masks.astype(jnp.bfloat16), real_or_fake="fake")
    d_real = combined_loss(fake_outputs, real_or_fake="real")
    d_fake = combined_loss(fake_outputs, real_or_fake="fake")
    outs = jax.block_until_ready((g_loss, g_tiled, g_bf16, d_real, d_fake))

    # Validate against a pure-JAX reference of the PyTorch module's math.
    g_ref = reference_loss(fake_outputs, fake_masks, real_masks, "fake")
    g_ref_bf16 = reference_loss(fake_outputs, fake_masks.astype(jnp.bfloat16),
                                real_masks.astype(jnp.bfloat16), "fake")
    r_ref = reference_loss(fake_outputs, real_or_fake="real")
    f_ref = reference_loss(fake_outputs, real_or_fake="fake")

    np.testing.assert_allclose(np.asarray(g_loss), np.asarray(g_ref), rtol=2e-5, atol=1e-4)
    np.testing.assert_allclose(np.asarray(g_tiled), np.asarray(g_ref), rtol=2e-5, atol=1e-4)
    np.testing.assert_allclose(np.asarray(g_bf16), np.asarray(g_ref_bf16), rtol=2e-5, atol=1e-4)
    np.testing.assert_allclose(np.asarray(d_real), np.asarray(r_ref), rtol=2e-5, atol=1e-4)
    np.testing.assert_allclose(np.asarray(d_fake), np.asarray(f_ref), rtol=2e-5, atol=1e-4)
    assert all(bool(jnp.isfinite(v)) for v in outs)

    print("KERNEL_OK")
</pallas_src>

<mosaic_0001>
module attributes {stable_mosaic.version = 11 : i64} {
  func.func @_gan_seg_stats_kernel(%arg0: i32, %arg1: i32, %arg2: memref<2x16xf32, #tpu.memory_space<vmem>>, %arg3: memref<4x32x32xf32, #tpu.memory_space<vmem>>, %arg4: memref<4x32x32xf32, #tpu.memory_space<vmem>>, %arg5: memref<1x4x4xf32, #tpu.memory_space<vmem>>, %arg6: memref<1x1x1xf32, #tpu.memory_space<vmem>>, %arg7: memref<4x1xf32, #tpu.memory_space<vmem>>, %arg8: memref<4x1xf32, #tpu.memory_space<vmem>>, %arg9: memref<4x1xf32, #tpu.memory_space<vmem>>, %arg10: memref<4x1xf32, #tpu.memory_space<vmem>>) attributes {dimension_semantics = [#tpu.dimension_semantics<parallel>, #tpu.dimension_semantics<arbitrary>], iteration_bounds = array<i64: 1, 1>, scalar_prefetch = 0 : i64, scratch_operands = 4 : i64, tpu.core_type = #tpu.core_type<tc>, window_params = [{pipeline_mode = #tpu.pipeline_mode<synchronous>, transform_indices = @transform_0, window_bounds = array<i64: 2, 16>}, {transform_indices = @transform_1, window_bounds = array<i64: 4, 32, 32>}, {transform_indices = @transform_2, window_bounds = array<i64: 4, 32, 32>}, {transform_indices = @transform_3, window_bounds = array<i64: 1, 4, 4>}, {transform_indices = @transform_4, window_bounds = array<i64: 1, 1, 1>}]} {
    %c0_i32 = arith.constant 0 : i32
    %0 = arith.cmpi eq, %arg1, %c0_i32 : i32
    %1 = arith.extui %0 : i1 to i32
    %c0_i32_0 = arith.constant 0 : i32
    %2 = arith.cmpi ne, %1, %c0_i32_0 : i32
    scf.if %2 {
      %cst_31 = arith.constant 0.000000e+00 : f32
      %35 = vector.broadcast %cst_31 : f32 to vector<4x1xf32>
      %c0_32 = arith.constant 0 : index
      %c0_33 = arith.constant 0 : index
      %36 = vector.load %arg7[%c0_32, %c0_33] : memref<4x1xf32, #tpu.memory_space<vmem>>, vector<4x1xf32>
      tpu.vector_store %arg7[%c0_32, %c0_33], %35 {strides = array<i32>} : memref<4x1xf32, #tpu.memory_space<vmem>>, vector<4x1xf32>,
      %cst_34 = arith.constant 0.000000e+00 : f32
      %37 = vector.broadcast %cst_34 : f32 to vector<4x1xf32>
      %c0_35 = arith.constant 0 : index
      %c0_36 = arith.constant 0 : index
      %38 = vector.load %arg8[%c0_35, %c0_36] : memref<4x1xf32, #tpu.memory_space<vmem>>, vector<4x1xf32>
      tpu.vector_store %arg8[%c0_35, %c0_36], %37 {strides = array<i32>} : memref<4x1xf32, #tpu.memory_space<vmem>>, vector<4x1xf32>,
      %cst_37 = arith.constant 0.000000e+00 : f32
      %39 = vector.broadcast %cst_37 : f32 to vector<4x1xf32>
      %c0_38 = arith.constant 0 : index
      %c0_39 = arith.constant 0 : index
      %40 = vector.load %arg9[%c0_38, %c0_39] : memref<4x1xf32, #tpu.memory_space<vmem>>, vector<4x1xf32>
      tpu.vector_store %arg9[%c0_38, %c0_39], %39 {strides = array<i32>} : memref<4x1xf32, #tpu.memory_space<vmem>>, vector<4x1xf32>,
      %cst_40 = arith.constant 0.000000e+00 : f32
      %41 = vector.broadcast %cst_40 : f32 to vector<4x1xf32>
      %c0_41 = arith.constant 0 : index
      %c0_42 = arith.constant 0 : index
      %42 = vector.load %arg10[%c0_41, %c0_42] : memref<4x1xf32, #tpu.memory_space<vmem>>, vector<4x1xf32>
      tpu.vector_store %arg10[%c0_41, %c0_42], %41 {strides = array<i32>} : memref<4x1xf32, #tpu.memory_space<vmem>>, vector<4x1xf32>,
    } else {
    }
    %c0 = arith.constant 0 : index
    %c0_1 = arith.constant 0 : index
    %c0_2 = arith.constant 0 : index
    %3 = vector.load %arg3[%c0, %c0_1, %c0_2] : memref<4x32x32xf32, #tpu.memory_space<vmem>>, vector<4x32x32xf32>
    %c0_3 = arith.constant 0 : index
    %c0_4 = arith.constant 0 : index
    %c0_5 = arith.constant 0 : index
    %4 = vector.load %arg4[%c0_3, %c0_4, %c0_5] : memref<4x32x32xf32, #tpu.memory_space<vmem>>, vector<4x32x32xf32>
    %c0_6 = arith.constant 0 : index
    %c0_7 = arith.constant 0 : index
    %5 = vector.load %arg7[%c0_6, %c0_7] : memref<4x1xf32, #tpu.memory_space<vmem>>, vector<4x1xf32>
    %6 = arith.mulf %3, %4 : vector<4x32x32xf32>
    %cst = arith.constant dense<0.000000e+00> : vector<4x32xf32>
    %7 = vector.multi_reduction <add>, %6, %cst [2] : vector<4x32x32xf32> to vector<4x32xf32>
    %8 = vector.shape_cast %7 : vector<4x32xf32> to vector<4x32x1xf32>
    %cst_8 = arith.constant dense<0.000000e+00> : vector<4x1xf32>
    %9 = vector.multi_reduction <add>, %8, %cst_8 [1] : vector<4x32x1xf32> to vector<4x1xf32>
    %10 = arith.addf %5, %9 : vector<4x1xf32>
    %c0_9 = arith.constant 0 : index
    %c0_10 = arith.constant 0 : index
    %11 = vector.load %arg7[%c0_9, %c0_10] : memref<4x1xf32, #tpu.memory_space<vmem>>, vector<4x1xf32>
    tpu.vector_store %arg7[%c0_9, %c0_10], %10 {strides = array<i32>} : memref<4x1xf32, #tpu.memory_space<vmem>>, vector<4x1xf32>,
    %c0_11 = arith.constant 0 : index
    %c0_12 = arith.constant 0 : index
    %12 = vector.load %arg8[%c0_11, %c0_12] : memref<4x1xf32, #tpu.memory_space<vmem>>, vector<4x1xf32>
    %cst_13 = arith.constant dense<0.000000e+00> : vector<4x32xf32>
    %13 = vector.multi_reduction <add>, %3, %cst_13 [2] : vector<4x32x32xf32> to vector<4x32xf32>
    %14 = vector.shape_cast %13 : vector<4x32xf32> to vector<4x32x1xf32>
    %cst_14 = arith.constant dense<0.000000e+00> : vector<4x1xf32>
    %15 = vector.multi_reduction <add>, %14, %cst_14 [1] : vector<4x32x1xf32> to vector<4x1xf32>
    %16 = arith.addf %12, %15 : vector<4x1xf32>
    %c0_15 = arith.constant 0 : index
    %c0_16 = arith.constant 0 : index
    %17 = vector.load %arg8[%c0_15, %c0_16] : memref<4x1xf32, #tpu.memory_space<vmem>>, vector<4x1xf32>
    tpu.vector_store %arg8[%c0_15, %c0_16], %16 {strides = array<i32>} : memref<4x1xf32, #tpu.memory_space<vmem>>, vector<4x1xf32>,
    %c0_17 = arith.constant 0 : index
    %c0_18 = arith.constant 0 : index
    %18 = vector.load %arg9[%c0_17, %c0_18] : memref<4x1xf32, #tpu.memory_space<vmem>>, vector<4x1xf32>
    %cst_19 = arith.constant dense<0.000000e+00> : vector<4x32xf32>
    %19 = vector.multi_reduction <add>, %4, %cst_19 [2] : vector<4x32x32xf32> to vector<4x32xf32>
    %20 = vector.shape_cast %19 : vector<4x32xf32> to vector<4x32x1xf32>
    %cst_20 = arith.constant dense<0.000000e+00> : vector<4x1xf32>
    %21 = vector.multi_reduction <add>, %20, %cst_20 [1] : vector<4x32x1xf32> to vector<4x1xf32>
    %22 = arith.addf %18, %21 : vector<4x1xf32>
    %c0_21 = arith.constant 0 : index
    %c0_22 = arith.constant 0 : index
    %23 = vector.load %arg9[%c0_21, %c0_22] : memref<4x1xf32, #tpu.memory_space<vmem>>, vector<4x1xf32>
    tpu.vector_store %arg9[%c0_21, %c0_22], %22 {strides = array<i32>} : memref<4x1xf32, #tpu.memory_space<vmem>>, vector<4x1xf32>,
    %c0_23 = arith.constant 0 : index
    %c0_24 = arith.constant 0 : index
    %24 = vector.load %arg10[%c0_23, %c0_24] : memref<4x1xf32, #tpu.memory_space<vmem>>, vector<4x1xf32>
    %25 = arith.subf %3, %4 : vector<4x32x32xf32>
    %26 = math.absf %25 : vector<4x32x32xf32>
    %cst_25 = arith.constant dense<0.000000e+00> : vector<4x32xf32>
    %27 = vector.multi_reduction <add>, %26, %cst_25 [2] : vector<4x32x32xf32> to vector<4x32xf32>
    %28 = vector.shape_cast %27 : vector<4x32xf32> to vector<4x32x1xf32>
    %cst_26 = arith.constant dense<0.000000e+00> : vector<4x1xf32>
    %29 = vector.multi_reduction <add>, %28, %cst_26 [1] : vector<4x32x1xf32> to vector<4x1xf32>
    %30 = arith.addf %24, %29 : vector<4x1xf32>
    %c0_27 = arith.constant 0 : index
    %c0_28 = arith.constant 0 : index
    %31 = vector.load %arg10[%c0_27, %c0_28] : memref<4x1xf32, #tpu.memory_space<vmem>>, vector<4x1xf32>
    tpu.vector_store %arg10[%c0_27, %c0_28], %30 {strides = array<i32>} : memref<4x1xf32, #tpu.memory_space<vmem>>, vector<4x1xf32>,
    %c0_i32_29 = arith.constant 0 : i32
    %32 = arith.cmpi eq, %arg1, %c0_i32_29 : i32
    %33 = arith.extui %32 : i1 to i32
    %c0_i32_30 = arith.constant 0 : i32
    %34 = arith.cmpi ne, %33, %c0_i32_30 : i32
    scf.if %34 {
      %c0_31 = arith.constant 0 : index
      %c0_32 = arith.constant 0 : index
      %35 = vector.load %arg2[%c0_31, %c0_32] : memref<2x16xf32, #tpu.memory_space<vmem>>, vector<2x16xf32>
      %cst_33 = arith.constant 0.000000e+00 : f32
      %36 = vector.broadcast %cst_33 : f32 to vector<2x16xf32>
      %37 = arith.maximumf %35, %36 : vector<2x16xf32>
      %38 = math.absf %35 : vector<2x16xf32>
      %cst_34 = arith.constant 0.000000e+00 : f32
      %39 = vector.broadcast %cst_34 : f32 to vector<2x16xf32>
      %40 = arith.subf %39, %38 : vector<2x16xf32>
      %41 = math.exp %40 : vector<2x16xf32>
      %42 = math.log1p %41 : vector<2x16xf32>
      %43 = arith.addf %37, %42 : vector<2x16xf32>
      %cst_35 = arith.constant dense<0.000000e+00> : vector<2xf32>
      %44 = vector.multi_reduction <add>, %43, %cst_35 [1] : vector<2x16xf32> to vector<2xf32>
      %45 = vector.shape_cast %44 : vector<2xf32> to vector<2x1xf32>
      %cst_36 = arith.constant dense<0.000000e+00> : vector<1xf32>
      %46 = vector.multi_reduction <add>, %45, %cst_36 [0] : vector<2x1xf32> to vector<1xf32>
      %47 = vector.shape_cast %46 : vector<1xf32> to vector<1x1xf32>
      %cst_37 = arith.constant 3.125000e-02 : f32
      %48 = vector.broadcast %cst_37 : f32 to vector<1x1xf32>
      %49 = arith.mulf %47, %48 : vector<1x1xf32>
      %50 = vector.shape_cast %49 : vector<1x1xf32> to vector<1x1x1xf32>
      %c0_38 = arith.constant 0 : index
      %c0_39 = arith.constant 0 : index
      %c0_40 = arith.constant 0 : index
      %51 = vector.load %arg6[%c0_38, %c0_39, %c0_40] : memref<1x1x1xf32, #tpu.memory_space<vmem>>, vector<1x1x1xf32>
      tpu.vector_store %arg6[%c0_38, %c0_39, %c0_40], %50 {strides = array<i32>} : memref<1x1x1xf32, #tpu.memory_space<vmem>>, vector<1x1x1xf32>,
      %c0_41 = arith.constant 0 : index
      %c0_42 = arith.constant 0 : index
      %52 = vector.load %arg7[%c0_41, %c0_42] : memref<4x1xf32, #tpu.memory_space<vmem>>, vector<4x1xf32>
      %53 = vector.shape_cast %52 : vector<4x1xf32> to vector<1x4x1xf32>
      %c0_43 = arith.constant 0 : index
      %c0_44 = arith.constant 0 : index
      %c0_45 = arith.constant 0 : index
      %54 = vector.load %arg5[%c0_43, %c0_44, %c0_45] : memref<1x4x4xf32, #tpu.memory_space<vmem>>, vector<1x4x1xf32>
      tpu.vector_store %arg5[%c0_43, %c0_44, %c0_45], %53 {strides = array<i32>} : memref<1x4x4xf32, #tpu.memory_space<vmem>>, vector<1x4x1xf32>,
      %c0_46 = arith.constant 0 : index
      %c0_47 = arith.constant 0 : index
      %55 = vector.load %arg8[%c0_46, %c0_47] : memref<4x1xf32, #tpu.memory_space<vmem>>, vector<4x1xf32>
      %56 = vector.shape_cast %55 : vector<4x1xf32> to vector<1x4x1xf32>
      %c0_48 = arith.constant 0 : index
      %c0_49 = arith.constant 0 : index
      %c1 = arith.constant 1 : index
      %57 = vector.load %arg5[%c0_48, %c0_49, %c1] : memref<1x4x4xf32, #tpu.memory_space<vmem>>, vector<1x4x1xf32>
      tpu.vector_store %arg5[%c0_48, %c0_49, %c1], %56 {strides = array<i32>} : memref<1x4x4xf32, #tpu.memory_space<vmem>>, vector<1x4x1xf32>,
      %c0_50 = arith.constant 0 : index
      %c0_51 = arith.constant 0 : index
      %58 = vector.load %arg9[%c0_50, %c0_51] : memref<4x1xf32, #tpu.memory_space<vmem>>, vector<4x1xf32>
      %59 = vector.shape_cast %58 : vector<4x1xf32> to vector<1x4x1xf32>
      %c0_52 = arith.constant 0 : index
      %c0_53 = arith.constant 0 : index
      %c2 = arith.constant 2 : index
      %60 = vector.load %arg5[%c0_52, %c0_53, %c2] : memref<1x4x4xf32, #tpu.memory_space<vmem>>, vector<1x4x1xf32>
      tpu.vector_store %arg5[%c0_52, %c0_53, %c2], %59 {strides = array<i32>} : memref<1x4x4xf32, #tpu.memory_space<vmem>>, vector<1x4x1xf32>,
      %c0_54 = arith.constant 0 : index
      %c0_55 = arith.constant 0 : index
      %61 = vector.load %arg10[%c0_54, %c0_55] : memref<4x1xf32, #tpu.memory_space<vmem>>, vector<4x1xf32>
      %62 = vector.shape_cast %61 : vector<4x1xf32> to vector<1x4x1xf32>
      %c0_56 = arith.constant 0 : index
      %c0_57 = arith.constant 0 : index
      %c3 = arith.constant 3 : index
      %63 = vector.load %arg5[%c0_56, %c0_57, %c3] : memref<1x4x4xf32, #tpu.memory_space<vmem>>, vector<1x4x1xf32>
      tpu.vector_store %arg5[%c0_56, %c0_57, %c3], %62 {strides = array<i32>} : memref<1x4x4xf32, #tpu.memory_space<vmem>>, vector<1x4x1xf32>,
    } else {
    }
    return
  }
  func.func @transform_0(%arg0: i32, %arg1: i32) -> (i32, i32) {
    %c0_i32 = arith.constant 0 : i32
    %c0_i32_0 = arith.constant 0 : i32
    %c0_i32_1 = arith.constant 0 : i32
    return %c0_i32, %c0_i32_0 : i32, i32
  }
  func.func @transform_1(%arg0: i32, %arg1: i32) -> (i32, i32, i32) {
    %c1_i32 = arith.constant 1 : i32
    %0 = arith.muli %arg0, %c1_i32 : i32
    %1 = arith.addi %0, %arg1 : i32
    %c0_i32 = arith.constant 0 : i32
    %c0_i32_0 = arith.constant 0 : i32
    %c0_i32_1 = arith.constant 0 : i32
    return %c0_i32, %1, %c0_i32_0 : i32, i32, i32
  }
  func.func @transform_2(%arg0: i32, %arg1: i32) -> (i32, i32, i32) {
    %c1_i32 = arith.constant 1 : i32
    %0 = arith.muli %arg0, %c1_i32 : i32
    %1 = arith.addi %0, %arg1 : i32
    %c0_i32 = arith.constant 0 : i32
    %c0_i32_0 = arith.constant 0 : i32
    %c0_i32_1 = arith.constant 0 : i32
    return %c0_i32, %1, %c0_i32_0 : i32, i32, i32
  }
  func.func @transform_3(%arg0: i32, %arg1: i32) -> (i32, i32, i32) {
    %c0_i32 = arith.constant 0 : i32
    %c0_i32_0 = arith.constant 0 : i32
    %c0_i32_1 = arith.constant 0 : i32
    return %arg0, %c0_i32, %c0_i32_0 : i32, i32, i32
  }
  func.func @transform_4(%arg0: i32, %arg1: i32) -> (i32, i32, i32) {
    %c0_i32 = arith.constant 0 : i32
    %c0_i32_0 = arith.constant 0 : i32
    %c0_i32_1 = arith.constant 0 : i32
    return %arg0, %c0_i32, %c0_i32_0 : i32, i32, i32
  }
}

</mosaic_0001>

<bundles_post_ra>
// kernel: combined_loss.1
= control target key start
LH: loop header
LB: loop body
LE: loop exit
PB: predicated region body
PF: predicated region fallthrough
CT: control target
= control target key end

     0   :  { %10 = vsyncpa [#allocation7], 0  ;;  %s1006_s0 = inlined_call_operand.vmem [shape: f32[2,16], index: 0, kind: input, shape index: {}]   ;;  %s1007_s1 = inlined_call_operand.hbm [shape: f32[4,32,32], index: 1, kind: input, shape index: {}]   ;;  %s1008_s2 = inlined_call_operand.hbm [shape: f32[4,32,32], index: 2, kind: input, shape index: {}]   ;;  %s1009_s3 = inlined_call_operand.vmem [shape: f32[1,4,4], index: 3, kind: output, shape index: {0}]   ;;  %s1010_s4 = inlined_call_operand.hbm [shape: f32[1,1,1], index: 4, kind: output, shape index: {1}]  }
   0x1   :  { %11 = vsyncpa [#allocation10], 0 }
   0x2   :  { %12 = vsyncpa [#allocation8], 0  ;;  %s693_s15 = smov [#allocation6]   ;;  %s621_s19 = scalar_lea.hbm %s1007_s1, 2048 }
   0x3   :  { %s24_s16 = sshll.u32 %s693_s15, 4  ;;  %p622_p0 = scmp.ne.s32.totalorder %s1007_s1, %s621_s19  ;;  %s25_s16 = int_to_ptr.vmem [resolvable:$true] %s24_s16 }
   0x4   :  { %p625_p1 = scmp.lt.u32.totalorder %s621_s19, %s1007_s1 }
   0x6   :  { %p627_p2 = pnand %p625_p1, %p622_p0 }
   0x8   :  { %630 = shalt.err (!%p627_p2)
}
   0x9   :  { %s631_s24 = scalar_lea.vmem %s25_s16, 2048  ;;  %p636_p4 = scmp.lt.s32.totalorder %s25_s16, %s25_s16 }
   0xa   :  { %p632_p3 = scmp.ne.s32.totalorder %s25_s16, %s631_s24  ;;  %p637_p5 = scmp.lt.s32.totalorder %s631_s24, %s631_s24 }
   0xc   :  { %p638_p6 = por %p637_p5, %p636_p4 }
   0xe   :  { %p639_p7 = pnand %p638_p6, %p632_p3 }
  0x10   :  { %642 = shalt.err (!%p639_p7)
}
  0x11   :  { %s694_s25 = smov 128   ;;  %s695_s26 = smov 8  }
  0x12   :  { %30 = dma.hbm_to_vmem [thread:$0]  %s1007_s1, 2048, %s25_s16, [#allocation7], %s694_s25, %s694_s25, %s695_s26  }
  0x13   :  { %s696_s29 = smov [#allocation9]   ;;  %s643_s7 = scalar_lea.hbm %s1008_s2, 2048 }
  0x14   :  { %s40_s30 = sshll.u32 %s696_s29, 4  ;;  %p644_p8 = scmp.ne.s32.totalorder %s1008_s2, %s643_s7  ;;  %s41_s30 = int_to_ptr.vmem [resolvable:$true] %s40_s30 }
  0x15   :  { %p647_p9 = scmp.lt.u32.totalorder %s643_s7, %s1008_s2 }
  0x17   :  { %p649_p10 = pnand %p647_p9, %p644_p8 }
  0x19   :  { %652 = shalt.err (!%p649_p10)
}
  0x1a   :  { %s653_s12 = scalar_lea.vmem %s41_s30, 2048  ;;  %p658_p12 = scmp.lt.s32.totalorder %s41_s30, %s41_s30 }
  0x1b   :  { %p654_p11 = scmp.ne.s32.totalorder %s41_s30, %s653_s12  ;;  %p659_p13 = scmp.lt.s32.totalorder %s653_s12, %s653_s12 }
  0x1d   :  { %p660_p0 = por %p659_p13, %p658_p12 }
  0x1f   :  { %p661_p1 = pnand %p660_p0, %p654_p11 }
  0x21   :  { %664 = shalt.err (!%p661_p1)
}
  0x22   :  { %46 = dma.hbm_to_vmem [thread:$0]  %s1008_s2, 2048, %s41_s30, [#allocation10], %s694_s25, %s694_s25, %s695_s26  }
  0x23   :  { %687 = dma.done.wait [#allocation7], 2048  }
  0x24   :  { %688 = vsyncadd [#allocation7], 4294965248 }
  0x25   :  { %689 = dma.done.wait [#allocation10], 2048  }
  0x26   :  { %690 = vsyncadd [#allocation10], 4294965248  ;;  %vm115_vm0 = vcmask 261120   ;;  %v751_v0 = vld [vmem:[#allocation6 + $0x20] sm:$0xff]  ;;  %v753_v2 = vld [vmem:[#allocation6 + $0x28] sm:$0xff]  ;;  %vm61_vm1 = vcmask 3072  }
  0x27   :  { %v66_v1 = vld [vmem:[#allocation6] sm:$0xff]  ;;  %v227_v3 = vsel %vm115_vm0, %v751_v0, 0.0  ;;  %v67_v5 = vld [vmem:[#allocation6 + $0x8] sm:$0xff]  ;;  %v230_v6 = vsel %vm115_vm0, %v753_v2, 0.0  ;;  %v773_v20 = vld [vmem:[#allocation6 + $0x30] sm:$0xff]  ;;  %vm550_vm3 = vcmask 123904  }
  0x28   :  { %v215_v4 = vsel %vm115_vm0, %v66_v1, 0.0  ;;  %228 = vadd.xlane.f32.xlu1 %v227_v3  ;;  %v218_v7 = vsel %vm115_vm0, %v67_v5, 0.0  ;;  %v761_v8 = vld [vmem:[#allocation6 + $0x48] sm:$0xff]  ;;  %v763_v9 = vld [vmem:[#allocation6 + $0x40] sm:$0xff]  ;;  %v775_v21 = vld [vmem:[#allocation6 + $0x10] sm:$0xff]  ;;  %v233_v22 = vsel %vm115_vm0, %v773_v20, 0.0 }
  0x29   :  { %216 = vadd.xlane.f32.xlu0 %v215_v4  ;;  %v242_v10 = vsel %vm115_vm0, %v761_v8, 0.0  ;;  %v239_v11 = vsel %vm115_vm0, %v763_v9, 0.0  ;;  %v83_v12 = vld [vmem:[#allocation9 + $0x8] sm:$0xff]  ;;  %v82_v13 = vld [vmem:[#allocation9] sm:$0xff]  ;;  %v221_v23 = vsel %vm115_vm0, %v775_v21, 0.0  ;;  %v84_v49 = vld [vmem:[#allocation9 + $0x10] sm:$0xff] }
  0x2a   :  { %v313_v14 = vsel %vm115_vm0, %v83_v12, 0.0  ;;  %v310_v15 = vsel %vm115_vm0, %v82_v13, 0.0  ;;  %v87_v16 = vld [vmem:[#allocation9 + $0x28] sm:$0xff]  ;;  %v86_v17 = vld [vmem:[#allocation9 + $0x20] sm:$0xff]  ;;  %v99_v24 = vmul.f32 %v82_v13, %v66_v1  ;;  %v100_v25 = vmul.f32 %v83_v12, %v67_v5  ;;  %v88_v52 = vld [vmem:[#allocation9 + $0x30] sm:$0xff]  ;;  %s699_s15 = smov 2  }
  0x2b   :  { %v325_v18 = vsel %vm115_vm0, %v87_v16, 0.0  ;;  %v322_v19 = vsel %vm115_vm0, %v86_v17, 0.0  ;;  %v781_v26 = vld [vmem:[#allocation6 + $0x68] sm:$0xff]  ;;  %v783_v27 = vld [vmem:[#allocation6 + $0x60] sm:$0xff]  ;;  %v406_v30 = vsub.f32 %v67_v5, %v83_v12  ;;  %v103_v31 = vmul.f32 %v86_v17, %v751_v0  ;;  %v92_v4 = vld [vmem:[#allocation9 + $0x50] sm:$0xff]  ;;  %s700_s16 = smov 3  }
  0x2c   :  { %231 = vadd.xlane.f32.xlu1 %v230_v6  ;;  %v786_v28 = vsel %vm115_vm0, %v99_v24, 0.0  ;;  %v789_v29 = vsel %vm115_vm0, %v100_v25, 0.0  ;;  %v254_v32 = vsel %vm115_vm0, %v781_v26, 0.0  ;;  %v251_v33 = vsel %vm115_vm0, %v783_v27, 0.0  ;;  %v91_v34 = vld [vmem:[#allocation9 + $0x48] sm:$0xff]  ;;  %v90_v35 = vld [vmem:[#allocation9 + $0x40] sm:$0xff] }
  0x2d   :  { %219 = vadd.xlane.f32.xlu0 %v218_v7  ;;  %v405_v36 = vsub.f32 %v66_v1, %v82_v13  ;;  %v104_v37 = vmul.f32 %v87_v16, %v753_v2  ;;  %v798_v38 = vsel %vm115_vm0, %v103_v31, 0.0  ;;  %v337_v40 = vsel %vm115_vm0, %v91_v34, 0.0  ;;  %v94_v59 = vld [vmem:[#allocation9 + $0x60] sm:$0xff]  ;;  %v95_v61 = vld [vmem:[#allocation9 + $0x68] sm:$0xff]  ;;  %v851_v24 = vld [vmem:[#allocation6 + $0x70] sm:$0xff]  ;;  %s701_s17 = smov [#allocation11]  }
  0x2e   :  { %v334_v41 = vsel %vm115_vm0, %v90_v35, 0.0  ;;  %v422_v42 = vand.u32 2147483647, %v406_v30  ;;  %v107_v43 = vmul.f32 %v90_v35, %v763_v9  ;;  %v410_v45 = vsub.f32 %v753_v2, %v87_v16  ;;  %v76_v2 = vld [vmem:[#allocation6 + $0x50] sm:$0xff]  ;;  %v854_v25 = vld [vmem:[#allocation6 + $0x38] sm:$0xff]  ;;  %s596_s18 = sshll.u32 %s701_s17, 4  ;;  %s597_s18 = int_to_ptr.vmem [resolvable:$true] %s596_s18 }
  0x2f   :  { %v801_v39 = vsel %vm115_vm0, %v104_v37, 0.0  ;;  %v421_v44 = vand.u32 2147483647, %v405_v36  ;;  %v409_v46 = vsub.f32 %v751_v0, %v86_v17  ;;  %v108_v47 = vmul.f32 %v91_v34, %v761_v8  ;;  %s665_s19 = scalar_lea.vmem %s597_s18, 16  ;;  %s669_s20 = scalar_lea.vmem %s597_s18, 32 }
  0x30   :  { %243 = vadd.xlane.f32.xlu1 %v242_v10  ;;  %v810_v48 = vsel %vm115_vm0, %v107_v43, 0.0  ;;  %v440_v51 = vsel %vm115_vm0, %v422_v42, 0.0  ;;  %v101_v53 = vmul.f32 %v84_v49, %v775_v21  ;;  %v426_v55 = vand.u32 2147483647, %v410_v45  ;;  %p666_p2 = scmp.ne.s32.totalorder %s597_s18, %s665_s19  ;;  %p670_p3 = scmp.lt.s32.totalorder %s597_s18, %s597_s18 }
  0x31   :  { %240 = vadd.xlane.f32.xlu0 %v239_v11  ;;  %v813_v50 = vsel %vm115_vm0, %v108_v47, 0.0  ;;  %v437_v54 = vsel %vm115_vm0, %v421_v44, 0.0  ;;  %v425_v56 = vand.u32 2147483647, %v409_v46  ;;  %v105_v57 = vmul.f32 %v88_v52, %v773_v20  ;;  %v872_v46 = vld [vmem:[#allocation9 + $0x38] sm:$0xff]  ;;  %p671_p4 = scmp.lt.s32.totalorder %s669_s20, %s665_s19 }
  0x32   :  { %v820_v58 = vsel %vm115_vm0, %v101_v53, 0.0  ;;  %v111_v62 = vmul.f32 %v94_v59, %v783_v27  ;;  %v452_v63 = vsel %vm115_vm0, %v426_v55, 0.0  ;;  %v112_v1 = vmul.f32 %v95_v61, %v781_v26  ;;  %v885_v53 = vld [vmem:[#allocation9 + $0x70] sm:$0xff] }
  0x33   :  { %v823_v60 = vsel %vm115_vm0, %v105_v57, 0.0  ;;  %v449_v0 = vsel %vm115_vm0, %v425_v56, 0.0  ;;  %v109_v6 = vmul.f32 %v92_v4, %v76_v2  ;;  %v316_v7 = vsel %vm115_vm0, %v84_v49, 0.0  ;;  %v891_v57 = vld [vmem:[#allocation9 + $0x58] sm:$0xff]  ;;  %p672_p5 = por %p671_p4, %p670_p3 }
  0x34   :  { %314 = vadd.xlane.f32.xlu1 %v313_v14  ;;  %v830_v3 = vsel %vm115_vm0, %v111_v62, 0.0  ;;  %v833_v5 = vsel %vm115_vm0, %v112_v1, 0.0  ;;  %v245_v10 = vsel %vm115_vm0, %v76_v2, 0.0  ;;  %v413_v11 = vsub.f32 %v763_v9, %v90_v35  ;;  %v846_v9 = vld [vmem:[#allocation6 + $0x18] sm:$0xff] }
  0x35   :  { %311 = vadd.xlane.f32.xlu0 %v310_v15  ;;  %v839_v12 = vsel %vm115_vm0, %v109_v6, 0.0  ;;  %v346_v13 = vsel %vm115_vm0, %v94_v59, 0.0  ;;  %v328_v14 = vsel %vm115_vm0, %v88_v52, 0.0  ;;  %v414_v16 = vsub.f32 %v761_v8, %v91_v34  ;;  %v897_v62 = vld [vmem:[#allocation6 + $0x78] sm:$0xff]  ;;  %p673_p6 = pnand %p672_p5, %p666_p2 }
  0x36   :  { %v429_v15 = vand.u32 2147483647, %v413_v11  ;;  %v407_v8 = vsub.f32 %v775_v21, %v84_v49  ;;  %v257_v30 = vsel %vm115_vm0, %v851_v24, 0.0  ;;  %v236_v31 = vsel %vm115_vm0, %v854_v25, 0.0  ;;  %v97_v6 = vld [vmem:[#allocation9 + $0x78] sm:$0xff] }
  0x37   :  { %v411_v34 = vsub.f32 %v773_v20, %v88_v52  ;;  %v340_v35 = vsel %vm115_vm0, %v92_v4, 0.0  ;;  %v415_v45 = vsub.f32 %v76_v2, %v92_v4  ;;  %v331_v47 = vsel %vm115_vm0, %v872_v46, 0.0  ;;  %v883_v52 = vld [vmem:[%s1006_s0] sm:$0x3]  ;;  %s698_s0 = smov 1  }
  0x38   :  { %326 = vadd.xlane.f32.xlu1 %v325_v18  ;;  %v461_v17 = vsel %vm115_vm0, %v429_v15, 0.0  ;;  %v349_v18 = vsel %vm115_vm0, %v95_v61, 0.0  ;;  %v352_v56 = vsel %vm115_vm0, %v885_v53, 0.0  ;;  %v260_v1 = vsel %vm115_vm0, %v897_v62, 0.0 }
  0x39   :  { %323 = vadd.xlane.f32.xlu0 %v322_v19  ;;  %v430_v19 = vand.u32 2147483647, %v414_v16  ;;  %v427_v37 = vand.u32 2147483647, %v411_v34  ;;  %vm204_vm4 = vcmask 1041409   ;;  %vm206_vm5 = vcmask 1042434  }
  0x3a   :  { %vm208_vm6 = vcmask 1043459   ;;  %vm554_vm7 = vcmask 1041408   ;;  %vm563_vm8 = vcmask 0  }
  0x3b   :  { %v455_v42 = vsel %vm115_vm0, %v427_v37, 0.0 }
  0x3c   :  { %234 = vadd.xlane.f32.xlu1 %v233_v22  ;;  %v224_v22 = vsel %vm115_vm0, %v846_v9, 0.0 }
  0x3d   :  { %222 = vadd.xlane.f32.xlu0 %v221_v23  ;;  %v464_v23 = vsel %vm115_vm0, %v430_v19, 0.0 }
  0x40   :  { %255 = vadd.xlane.f32.xlu1 %v254_v32  ;;  %v423_v32 = vand.u32 2147483647, %v407_v8 }
  0x41   :  { %252 = vadd.xlane.f32.xlu0 %v251_v33  ;;  %v417_v33 = vsub.f32 %v783_v27, %v94_v59  ;;  %v867_v27 = vld [vmem:[#allocation6 + $0x58] sm:$0xff]  ;;  %v412_v59 = vsub.f32 %v854_v25, %v872_v46 }
  0x42   :  { %v443_v21 = vsel %vm115_vm0, %v423_v32, 0.0  ;;  %v248_v20 = vsel %vm115_vm0, %v867_v27, 0.0  ;;  %v416_v16 = vsub.f32 %v867_v27, %v891_v57  ;;  %v697_v32 = vmov 0.0  }
  0x43   :  { %v433_v36 = vand.u32 2147483647, %v417_v33  ;;  %v428_v2 = vand.u32 2147483647, %v412_v59  ;;  %63 = vst.msk [vmem:[#allocation3] sm:$0xf] %vm61_vm1, %v697_v32 }
  0x44   :  { %338 = vadd.xlane.f32.xlu1 %v337_v40  ;;  %v418_v40 = vsub.f32 %v781_v26, %v95_v61  ;;  %v874_v26 = vld [vmem:[#allocation9 + $0x18] sm:$0xff]  ;;  %62 = vst.msk [vmem:[#allocation2] sm:$0xf] %vm61_vm1, %v697_v32  ;;  %64 = vst.msk [vmem:[#allocation4] sm:$0xf] %vm61_vm1, %v697_v32 }
  0x45   :  { %335 = vadd.xlane.f32.xlu0 %v334_v41  ;;  %v473_v41 = vsel %vm115_vm0, %v433_v36, 0.0  ;;  %v319_v49 = vsel %vm115_vm0, %v874_v26, 0.0  ;;  %v408_v61 = vsub.f32 %v846_v9, %v874_v26  ;;  %65 = vst.msk [vmem:[#allocation5] sm:$0xf] %vm61_vm1, %v697_v32 }
  0x46   :  { %v434_v43 = vand.u32 2147483647, %v418_v40 }
  0x47   :  { %v424_v4 = vand.u32 2147483647, %v408_v61 }
  0x48   :  { %441 = vadd.xlane.f32.xlu1 %v440_v51  ;;  %v476_v44 = vsel %vm115_vm0, %v434_v43, 0.0  ;;  %v431_v51 = vand.u32 2147483647, %v415_v45 }
  0x49   :  { %438 = vadd.xlane.f32.xlu0 %v437_v54  ;;  %v536_v54 = vand.u32 2147483647, %v883_v52 }
  0x4a   :  { %v467_v55 = vsel %vm115_vm0, %v431_v51, 0.0 }
  0x4c   :  { %453 = vadd.xlane.f32.xlu1 %v452_v63  ;;  %v343_v63 = vsel %vm115_vm0, %v891_v57, 0.0 }
  0x4d   :  { %450 = vadd.xlane.f32.xlu0 %v449_v0  ;;  %v537_v0 = vsub.f32 0.0, %v536_v54 }
  0x4f   :  { %v538_v11 = vmul.f32 1.442695, %v537_v0 }
  0x50   :  { %317 = vadd.xlane.f32.xlu1 %v316_v7  ;;  %v419_v7 = vsub.f32 %v851_v24, %v885_v53 }
  0x51   :  { %246 = vadd.xlane.f32.xlu0 %v245_v10  ;;  %v420_v10 = vsub.f32 %v897_v62, %v97_v6  ;;  %617 = vpow2.f32 %v538_v11 }
  0x52   :  { %v435_v15 = vand.u32 2147483647, %v419_v7 }
  0x53   :  { %v436_v19 = vand.u32 2147483647, %v420_v10 }
  0x54   :  { %347 = vadd.xlane.f32.xlu1 %v346_v13  ;;  %v458_v13 = vsel %vm115_vm0, %v428_v2, 0.0 }
  0x55   :  { %329 = vadd.xlane.f32.xlu0 %v328_v14  ;;  %v446_v14 = vsel %vm115_vm0, %v424_v4, 0.0 }
  0x58   :  { %462 = vadd.xlane.f32.xlu1 %v461_v17  ;;  %v355_v17 = vsel %vm115_vm0, %v97_v6, 0.0 }
  0x59   :  { %350 = vadd.xlane.f32.xlu0 %v349_v18  ;;  %v479_v18 = vsel %vm115_vm0, %v435_v15, 0.0 }
  0x5c   :  { %225 = vadd.xlane.f32.xlu1 %v224_v22  ;;  %v432_v22 = vand.u32 2147483647, %v416_v16 }
  0x5d   :  { %465 = vadd.xlane.f32.xlu0 %v464_v23  ;;  %v482_v23 = vsel %vm115_vm0, %v436_v19, 0.0 }
  0x5e   :  { %v470_v8 = vsel %vm115_vm0, %v432_v22, 0.0 }
  0x60   :  { %258 = vadd.xlane.f32.xlu1 %v257_v30  ;;  %v618_v30 = vpop.eup %617 }
  0x61   :  { %237 = vadd.xlane.f32.xlu0 %v236_v31  ;;  %v540_v31 = vadd.f32 1.0, %v618_v30  ;;  %v546_v33 = vand.u32 2147483647, %v618_v30 }
  0x63   :  { %619 = vlog2.f32 %v540_v31  ;;  %vm547_vm2 = vcmp.lt.f32.partialorder %v546_v33, 0.0004427343 }
  0x64   :  { %444 = vadd.xlane.f32.xlu1 %v443_v21 }
  0x65   :  { %341 = vadd.xlane.f32.xlu0 %v340_v35  ;;  %v535_v35 = vmax.f32 %v883_v52, 0.0 }
  0x68   :  { %474 = vadd.xlane.f32.xlu1 %v473_v41 }
  0x69   :  { %456 = vadd.xlane.f32.xlu0 %v455_v42 }
  0x6c   :  { %249 = vadd.xlane.f32.xlu1 %v248_v20 }
  0x6d   :  { %477 = vadd.xlane.f32.xlu0 %v476_v44 }
  0x70   :  { %332 = vadd.xlane.f32.xlu1 %v331_v47 }
  0x71   :  { %320 = vadd.xlane.f32.xlu0 %v319_v49 }
  0x74   :  { %468 = vadd.xlane.f32.xlu1 %v467_v55 }
  0x75   :  { %353 = vadd.xlane.f32.xlu0 %v352_v56 }
  0x78   :  { %344 = vadd.xlane.f32.xlu1 %v343_v63 }
  0x79   :  { %261 = vadd.xlane.f32.xlu0 %v260_v1 }
  0x7c   :  { %459 = vadd.xlane.f32.xlu1 %v458_v13 }
  0x7d   :  { %447 = vadd.xlane.f32.xlu0 %v446_v14 }
  0x80   :  { %356 = vadd.xlane.f32.xlu1 %v355_v17 }
  0x81   :  { %480 = vadd.xlane.f32.xlu0 %v479_v18 }
  0x84   :  { %483 = vadd.xlane.f32.xlu1 %v482_v23 }
  0x85   :  { %471 = vadd.xlane.f32.xlu0 %v470_v8 }
  0x88   :  { %120 = vadd.xlane.f32.xlu1 %v789_v29  ;;  %v102_v29 = vmul.f32 %v874_v26, %v846_v9 }
  0x89   :  { %117 = vadd.xlane.f32.xlu0 %v786_v28  ;;  %v543_v28 = vmul.f32 -0.5, %v618_v30 }
  0x8c   :  { %132 = vadd.xlane.f32.xlu1 %v801_v39  ;;  %v620_v39 = vpop.eup %619 }
  0x8d   :  { %129 = vadd.xlane.f32.xlu0 %v798_v38  ;;  %v544_v38 = vadd.f32 1.0, %v543_v28  ;;  %v542_v34 = vmul.f32 0.6931472, %v620_v39 }
  0x90   :  { %144 = vadd.xlane.f32.xlu1 %v813_v50  ;;  %v125_v50 = vsel %vm115_vm0, %v102_v29, 0.0 }
  0x91   :  { %141 = vadd.xlane.f32.xlu0 %v810_v48  ;;  %v106_v48 = vmul.f32 %v872_v46, %v854_v25  ;;  %v114_v25 = vmul.f32 %v97_v6, %v897_v62 }
  0x93   :  { %v137_v9 = vsel %vm115_vm0, %v106_v48, 0.0  ;;  %v161_v36 = vsel %vm115_vm0, %v114_v25, 0.0 }
  0x94   :  { %135 = vadd.xlane.f32.xlu1 %v823_v60  ;;  %v545_v60 = vmul.f32 %v618_v30, %v544_v38 }
  0x95   :  { %123 = vadd.xlane.f32.xlu0 %v820_v58  ;;  %v113_v58 = vmul.f32 %v885_v53, %v851_v24 }
  0x96   :  { %v548_v21 = vsel %vm547_vm2, %v545_v60, %v542_v34 }
  0x98   :  { %156 = vadd.xlane.f32.xlu1 %v833_v5  ;;  %v110_v5 = vmul.f32 %v891_v57, %v867_v27 }
  0x99   :  { %153 = vadd.xlane.f32.xlu0 %v830_v3  ;;  %v158_v3 = vsel %vm115_vm0, %v113_v58, 0.0 }
  0x9a   :  { %v149_v24 = vsel %vm115_vm0, %v110_v5, 0.0 }
  0x9c   :  { %126 = vadd.xlane.f32.xlu1 %v125_v50 }
  0x9d   :  { %147 = vadd.xlane.f32.xlu0 %v839_v12  ;;  %v549_v12 = vadd.f32 %v548_v21, %v535_v35 }
  0x9f   :  { %v551_v37 = vsel %vm550_vm3, %v549_v12, 0.0 }
  0xa0   :  { %159 = vadd.xlane.f32.xlu1 %v158_v3 }
  0xa1   :  { %138 = vadd.xlane.f32.xlu0 %v137_v9 }
  0xa4   :  { %162 = vadd.xlane.f32.xlu1 %v161_v36 }
  0xa5   :  { %150 = vadd.xlane.f32.xlu0 %v149_v24 }
  0xa9   :  { %552 = vadd.xlane.f32.xlu0 %v551_v37 }
  0xb5   :  { %v229_v40 = vpop.xlane.xlu1 %228 }
  0xb6   :  { %v217_v41 = vpop.xlane.xlu0 %216 }
  0xb9   :  { %v232_v42 = vpop.xlane.xlu1 %231 }
  0xba   :  { %v220_v43 = vpop.xlane.xlu0 %219  ;;  %v272_v27 = vadd.f32 %v232_v42, %v229_v40 }
  0xbb   :  { %v263_v20 = vadd.f32 %v220_v43, %v217_v41 }
  0xbd   :  { %v244_v44 = vpop.xlane.xlu1 %243 }
  0xbe   :  { %v241_v45 = vpop.xlane.xlu0 %240 }
  0xbf   :  { %v281_v46 = vadd.f32 %v244_v44, %v241_v45 }
  0xc1   :  { %v315_v26 = vpop.xlane.xlu1 %314 }
  0xc2   :  { %v312_v47 = vpop.xlane.xlu0 %311 }
  0xc3   :  { %v358_v49 = vadd.f32 %v315_v26, %v312_v47 }
  0xc5   :  { %v327_v51 = vpop.xlane.xlu1 %326 }
  0xc6   :  { %v324_v52 = vpop.xlane.xlu0 %323 }
  0xc7   :  { %v367_v53 = vadd.f32 %v327_v51, %v324_v52 }
  0xc9   :  { %v235_v54 = vpop.xlane.xlu1 %234 }
  0xca   :  { %v223_v55 = vpop.xlane.xlu0 %222  ;;  %v273_v17 = vadd.f32 %v272_v27, %v235_v54 }
  0xcb   :  { %v264_v13 = vadd.f32 %v263_v20, %v223_v55 }
  0xcd   :  { %v256_v56 = vpop.xlane.xlu1 %255 }
  0xce   :  { %v253_v57 = vpop.xlane.xlu0 %252 }
  0xcf   :  { %v290_v54 = vadd.f32 %v256_v56, %v253_v57 }
  0xd1   :  { %v339_v59 = vpop.xlane.xlu1 %338 }
  0xd2   :  { %v336_v61 = vpop.xlane.xlu0 %335 }
  0xd3   :  { %v376_v26 = vadd.f32 %v339_v59, %v336_v61 }
  0xd5   :  { %v944_v62 = vpop.xlane.xlu1 %441 }
  0xd6   :  { %v946_v63 = vpop.xlane.xlu0 %438 }
  0xd7   :  { %v485_v59 = vadd.f32 %v944_v62, %v946_v63 }
  0xd9   :  { %v454_v0 = vpop.xlane.xlu1 %453 }
  0xda   :  { %v451_v1 = vpop.xlane.xlu0 %450 }
  0xdd   :  { %v318_v2 = vpop.xlane.xlu1 %317 }
  0xde   :  { %v247_v4 = vpop.xlane.xlu0 %246  ;;  %v359_v21 = vadd.f32 %v358_v49, %v318_v2 }
  0xdf   :  { %v282_v34 = vadd.f32 %v281_v46, %v247_v4  ;;  %v494_v4 = vadd.f32 %v454_v0, %v451_v1 }
  0xe1   :  { %v948_v6 = vpop.xlane.xlu1 %347 }
  0xe2   :  { %v330_v7 = vpop.xlane.xlu0 %329 }
  0xe3   :  { %v368_v24 = vadd.f32 %v367_v53, %v330_v7 }
  0xe5   :  { %v950_v10 = vpop.xlane.xlu1 %462 }
  0xe6   :  { %v952_v11 = vpop.xlane.xlu0 %350 }
  0xe7   :  { %v385_v0 = vadd.f32 %v952_v11, %v948_v6 }
  0xe9   :  { %v226_v14 = vpop.xlane.xlu1 %225 }
  0xea   :  { %v954_v15 = vpop.xlane.xlu0 %465  ;;  %v265_v16 = vadd.f32 %v264_v13, %v226_v14 }
  0xec   :  { %v266_v18 = vrot.slane %v265_v16, 4 }
  0xed   :  { %v259_v19 = vpop.xlane.xlu1 %258 }
  0xee   :  { %v238_v22 = vpop.xlane.xlu0 %237  ;;  %v267_v23 = vadd.f32 %v266_v18, %v265_v16  ;;  %v291_v7 = vadd.f32 %v290_v54, %v259_v19 }
  0xef   :  { %v274_v8 = vadd.f32 %v273_v17, %v238_v22 }
  0xf0   :  { %v268_v30 = vrot.slane %v267_v23, 2 }
  0xf1   :  { %v275_v31 = vrot.slane %v274_v8, 4  ;;  %v445_v32 = vpop.xlane.xlu1 %444 }
  0xf2   :  { %v342_v28 = vpop.xlane.xlu0 %341  ;;  %v269_v29 = vadd.f32 %v268_v30, %v267_v23  ;;  %v486_v1 = vadd.f32 %v485_v59, %v445_v32 }
  0xf3   :  { %v276_v38 = vadd.f32 %v275_v31, %v274_v8  ;;  %v377_v49 = vadd.f32 %v376_v26, %v342_v28 }
  0xf4   :  { %v270_v50 = vrot.slane %v269_v29, 1 }
  0xf5   :  { %v277_v39 = vrot.slane %v276_v38, 2  ;;  %v956_v33 = vpop.xlane.xlu1 %474 }
  0xf6   :  { %v457_v48 = vpop.xlane.xlu0 %456  ;;  %v271_v5 = vadd.f32 %v270_v50, %v269_v29 }
  0xf7   :  { %v278_v58 = vadd.f32 %v277_v39, %v276_v38  ;;  %v495_v61 = vadd.f32 %v494_v4, %v457_v48 }
  0xf9   :  { %v279_v60 = vrot.slane %v278_v58, 1  ;;  %v250_v9 = vpop.xlane.xlu1 %249 }
  0xfa   :  { %v478_v3 = vpop.xlane.xlu0 %477  ;;  %v283_v35 = vadd.f32 %v282_v34, %v250_v9 }
  0xfb   :  { %v280_v25 = vadd.f32 %v279_v60, %v278_v58  ;;  %v512_v6 = vadd.f32 %v478_v3, %v956_v33  ;;  %v214_v3 = vld [vmem:[#allocation3] sm:$0xf] }
  0xfc   :  { %v284_v12 = vrot.slane %v283_v35, 4 }
  0xfd   :  { %v303_v36 = vsel %vm204_vm4, %v280_v25, %v271_v5  ;;  %v333_v37 = vpop.xlane.xlu1 %332 }
  0xfe   :  { %v321_v40 = vpop.xlane.xlu0 %320  ;;  %v285_v41 = vadd.f32 %v284_v12, %v283_v35  ;;  %v369_v42 = vadd.f32 %v368_v24, %v333_v37 }
  0xff   :  { %v360_v43 = vadd.f32 %v359_v21, %v321_v40  ;;  %v503_v21 = vadd.f32 %v954_v15, %v950_v10 }
 0x100   :  { %v286_v27 = vrot.slane %v285_v41, 2  ;;  %v370_v20 = vrot.slane %v369_v42, 4 }
 0x101   :  { %v361_v44 = vrot.slane %v360_v43, 4  ;;  %v469_v45 = vpop.xlane.xlu1 %468 }
 0x102   :  { %v354_v46 = vpop.xlane.xlu0 %353  ;;  %v287_v47 = vadd.f32 %v286_v27, %v285_v41  ;;  %v371_v51 = vadd.f32 %v370_v20, %v369_v42  ;;  %v504_v42 = vadd.f32 %v503_v21, %v469_v45 }
 0x103   :  { %v362_v52 = vadd.f32 %v361_v44, %v360_v43  ;;  %v386_v48 = vadd.f32 %v385_v0, %v354_v46 }
 0x104   :  { %v288_v53 = vrot.slane %v287_v47, 1  ;;  %v372_v55 = vrot.slane %v371_v51, 2 }
 0x105   :  { %v363_v2 = vrot.slane %v362_v52, 2  ;;  %v345_v13 = vpop.xlane.xlu1 %344 }
 0x106   :  { %v262_v14 = vpop.xlane.xlu0 %261  ;;  %v289_v16 = vadd.f32 %v288_v53, %v287_v47  ;;  %v373_v17 = vadd.f32 %v372_v55, %v371_v51  ;;  %v378_v22 = vadd.f32 %v377_v49, %v345_v13 }
 0x107   :  { %v364_v18 = vadd.f32 %v363_v2, %v362_v52  ;;  %v292_v23 = vadd.f32 %v291_v7, %v262_v14 }
 0x108   :  { %v304_v56 = vsel %vm206_vm5, %v289_v16, %v303_v36  ;;  %v374_v57 = vrot.slane %v373_v17, 1  ;;  %v379_v30 = vrot.slane %v378_v22, 4 }
 0x109   :  { %v365_v8 = vrot.slane %v364_v18, 1  ;;  %v293_v19 = vrot.slane %v292_v23, 4  ;;  %v460_v31 = vpop.xlane.xlu1 %459 }
 0x10a   :  { %v448_v28 = vpop.xlane.xlu0 %447  ;;  %v375_v29 = vadd.f32 %v374_v57, %v373_v17  ;;  %v380_v39 = vadd.f32 %v379_v30, %v378_v22  ;;  %v496_v50 = vadd.f32 %v495_v61, %v460_v31  ;;  %v309_v57 = vld [vmem:[#allocation4] sm:$0xf] }
 0x10b   :  { %v366_v38 = vadd.f32 %v365_v8, %v364_v18  ;;  %v294_v58 = vadd.f32 %v293_v19, %v292_v23  ;;  %v487_v62 = vadd.f32 %v486_v1, %v448_v28 }
 0x10c   :  { %v381_v34 = vrot.slane %v380_v39, 2  ;;  %v497_v60 = vrot.slane %v496_v50, 4 }
 0x10d   :  { %v398_v63 = vsel %vm204_vm4, %v375_v29, %v366_v38  ;;  %v295_v9 = vrot.slane %v294_v58, 2  ;;  %v488_v5 = vrot.slane %v487_v62, 4  ;;  %v357_v25 = vpop.xlane.xlu1 %356 }
 0x10e   :  { %v481_v35 = vpop.xlane.xlu0 %480  ;;  %v498_v11 = vadd.f32 %v497_v60, %v496_v50  ;;  %v387_v32 = vadd.f32 %v386_v48, %v357_v25  ;;  %v382_v24 = vadd.f32 %v381_v34, %v380_v39  ;;  %v404_v60 = vld [vmem:[#allocation5] sm:$0xf] }
 0x10f   :  { %v296_v36 = vadd.f32 %v295_v9, %v294_v58  ;;  %v489_v12 = vadd.f32 %v488_v5, %v487_v62  ;;  %v513_v41 = vadd.f32 %v512_v6, %v481_v35 }
 0x110   :  { %v499_v37 = vrot.slane %v498_v11, 2  ;;  %v388_v40 = vrot.slane %v387_v32, 4  ;;  %v383_v33 = vrot.slane %v382_v24, 1 }
 0x111   :  { %v297_v43 = vrot.slane %v296_v36, 1  ;;  %v490_v27 = vrot.slane %v489_v12, 2  ;;  %v484_v20 = vpop.xlane.xlu1 %483 }
 0x112   :  { %v472_v44 = vpop.xlane.xlu0 %471  ;;  %v389_v46 = vadd.f32 %v388_v40, %v387_v32  ;;  %v514_v26 = vadd.f32 %v513_v41, %v484_v20  ;;  %v500_v52 = vadd.f32 %v499_v37, %v498_v11  ;;  %v384_v13 = vadd.f32 %v383_v33, %v382_v24 }
 0x113   :  { %v298_v47 = vadd.f32 %v297_v43, %v296_v36  ;;  %v505_v51 = vadd.f32 %v504_v42, %v472_v44  ;;  %v491_v10 = vadd.f32 %v490_v27, %v489_v12 }
 0x114   :  { %v390_v15 = vrot.slane %v389_v46, 2  ;;  %v515_v54 = vrot.slane %v514_v26, 4  ;;  %v501_v16 = vrot.slane %v500_v52, 1  ;;  %v399_v30 = vsel %vm206_vm5, %v384_v13, %v398_v63 }
 0x115   :  { %v305_v49 = vsel %vm208_vm6, %v298_v47, %v304_v56  ;;  %v506_v53 = vrot.slane %v505_v51, 4  ;;  %v121_v45 = vpop.xlane.xlu1 %120  ;;  %v492_v17 = vrot.slane %v491_v10, 1 }
 0x116   :  { %v118_v55 = vpop.xlane.xlu0 %117  ;;  %v307_v2 = vadd.f32 %v305_v49, %v214_v3  ;;  %v391_v4 = vadd.f32 %v390_v15, %v389_v46  ;;  %v516_v7 = vadd.f32 %v515_v54, %v514_v26  ;;  %v502_v1 = vadd.f32 %v501_v16, %v500_v52 }
 0x117   :  { %v507_v14 = vadd.f32 %v506_v53, %v505_v51  ;;  %v493_v19 = vadd.f32 %v492_v17, %v491_v10  ;;  %v164_v35 = vadd.f32 %v121_v45, %v118_v55 }
 0x118   :  { %308 = vst.msk [vmem:[#allocation3] sm:$0xf] %vm61_vm1, %v307_v2  ;;  %v392_v18 = vrot.slane %v391_v4, 1  ;;  %v517_v22 = vrot.slane %v516_v7, 2 }
 0x119   :  { %v508_v59 = vrot.slane %v507_v14, 2  ;;  %v133_v23 = vpop.xlane.xlu1 %132  ;;  %v525_v34 = vsel %vm204_vm4, %v502_v1, %v493_v19 }
 0x11a   :  { %v130_v61 = vpop.xlane.xlu0 %129  ;;  %v393_v8 = vadd.f32 %v392_v18, %v391_v4  ;;  %v518_v56 = vadd.f32 %v517_v22, %v516_v7 }
 0x11b   :  { %v509_v0 = vadd.f32 %v508_v59, %v507_v14  ;;  %v173_v24 = vadd.f32 %v133_v23, %v130_v61 }
 0x11c   :  { %v400_v31 = vsel %vm208_vm6, %v393_v8, %v399_v30  ;;  %v519_v28 = vrot.slane %v518_v56, 1 }
 0x11d   :  { %v402_v29 = vadd.f32 %v400_v31, %v309_v57  ;;  %v510_v38 = vrot.slane %v509_v0, 1  ;;  %v145_v50 = vpop.xlane.xlu1 %144 }
 0x11e   :  { %v142_v39 = vpop.xlane.xlu0 %141  ;;  %v520_v58 = vadd.f32 %v519_v28, %v518_v56 }
 0x11f   :  { %403 = vst.msk [vmem:[#allocation4] sm:$0xf] %vm61_vm1, %v402_v29  ;;  %v511_v62 = vadd.f32 %v510_v38, %v509_v0  ;;  %v567_v48 = vld [vmem:[#allocation3] sm:$0xf]  ;;  %v182_v40 = vadd.f32 %v145_v50, %v142_v39  ;;  %v98_v50 = vld [vmem:[#allocation2] sm:$0xf] }
 0x120   :  { %569 = vrot.lane.b32.xlu1 %v567_v48, %s698_s0 }
 0x121   :  { %v526_v63 = vsel %vm206_vm5, %v511_v62, %v525_v34  ;;  %v136_v5 = vpop.xlane.xlu1 %135 }
 0x122   :  { %v124_v9 = vpop.xlane.xlu0 %123  ;;  %v527_v25 = vsel %vm208_vm6, %v520_v58, %v526_v63  ;;  %v174_v41 = vadd.f32 %v173_v24, %v136_v5 }
 0x123   :  { %v529_v6 = vadd.f32 %v527_v25, %v404_v60  ;;  %v165_v36 = vadd.f32 %v164_v35, %v124_v9 }
 0x125   :  { %530 = vst.msk [vmem:[#allocation5] sm:$0xf] %vm61_vm1, %v529_v6  ;;  %v157_v32 = vpop.xlane.xlu1 %156 }
 0x126   :  { %v154_v11 = vpop.xlane.xlu0 %153  ;;  %v574_v21 = vld [vmem:[#allocation4] sm:$0xf] }
 0x127   :  { %576 = vrot.lane.b32.xlu0 %v574_v21, %s699_s15  ;;  %v191_v42 = vadd.f32 %v157_v32, %v154_v11 }
 0x129   :  { %v127_v37 = vpop.xlane.xlu1 %126 }
 0x12a   :  { %v148_v12 = vpop.xlane.xlu0 %147  ;;  %v166_v43 = vadd.f32 %v165_v36, %v127_v37 }
 0x12b   :  { %v183_v26 = vadd.f32 %v182_v40, %v148_v12 }
 0x12c   :  { %v581_v27 = vld [vmem:[#allocation5] sm:$0xf]  ;;  %v167_v20 = vrot.slane %v166_v43, 4 }
 0x12d   :  { %583 = vrot.lane.b32.xlu1 %v581_v27, %s700_s16  ;;  %v160_v46 = vpop.xlane.xlu1 %159 }
 0x12e   :  { %v139_v44 = vpop.xlane.xlu0 %138  ;;  %v168_v33 = vadd.f32 %v167_v20, %v166_v43  ;;  %v192_v47 = vadd.f32 %v191_v42, %v160_v46 }
 0x12f   :  { %v175_v3 = vadd.f32 %v174_v41, %v139_v44 }
 0x130   :  { %v169_v51 = vrot.slane %v168_v33, 2 }
 0x131   :  { %v176_v52 = vrot.slane %v175_v3, 4  ;;  %v163_v15 = vpop.xlane.xlu1 %162 }
 0x132   :  { %v151_v10 = vpop.xlane.xlu0 %150  ;;  %v170_v54 = vadd.f32 %v169_v51, %v168_v33  ;;  %v193_v55 = vadd.f32 %v192_v47, %v163_v15 }
 0x133   :  { %v177_v49 = vadd.f32 %v176_v52, %v175_v3  ;;  %v184_v53 = vadd.f32 %v183_v26, %v151_v10 }
 0x134   :  { %v194_v4 = vrot.slane %v193_v55, 4  ;;  %v171_v7 = vrot.slane %v170_v54, 1 }
 0x135   :  { %v178_v45 = vrot.slane %v177_v49, 2  ;;  %v185_v2 = vrot.slane %v184_v53, 4 }
 0x136   :  { %v553_v13 = vpop.xlane.xlu0 %552  ;;  %v195_v17 = vadd.f32 %v194_v4, %v193_v55  ;;  %v172_v57 = vadd.f32 %v171_v7, %v170_v54 }
 0x137   :  { %v179_v14 = vadd.f32 %v178_v45, %v177_v49  ;;  %v186_v16 = vadd.f32 %v185_v2, %v184_v53  ;;  %v555_v18 = vsel %vm554_vm7, %v553_v13, 0.0 }
 0x138   :  { %v196_v61 = vrot.slane %v195_v17, 2  ;;  %v556_v23 = vrot.slane %v555_v18, 4 }
 0x139   :  { %v180_v22 = vrot.slane %v179_v14, 1  ;;  %v187_v59 = vrot.slane %v186_v16, 2 }
 0x13a   :  { %v197_v30 = vadd.f32 %v196_v61, %v195_v17  ;;  %v557_v0 = vadd.f32 %v556_v23, %v555_v18 }
 0x13b   :  { %v181_v8 = vadd.f32 %v180_v22, %v179_v14  ;;  %v188_v56 = vadd.f32 %v187_v59, %v186_v16 }
 0x13c   :  { %v198_v19 = vrot.slane %v197_v30, 1  ;;  %v558_v31 = vrot.slane %v557_v0, 2 }
 0x13d   :  { %v189_v1 = vrot.slane %v188_v56, 1  ;;  %v205_v28 = vsel %vm204_vm4, %v181_v8, %v172_v57 }
 0x13e   :  { %v199_v38 = vadd.f32 %v198_v19, %v197_v30  ;;  %v559_v39 = vadd.f32 %v558_v31, %v557_v0 }
 0x13f   :  { %v190_v29 = vadd.f32 %v189_v1, %v188_v56 }
 0x140   :  { %v560_v62 = vrot.slane %v559_v39, 1 }
 0x141   :  { %v207_v58 = vsel %vm206_vm5, %v190_v29, %v205_v28 }
 0x142   :  { %v209_v48 = vsel %vm208_vm6, %v199_v38, %v207_v58  ;;  %v561_v60 = vadd.f32 %v560_v62, %v559_v39 }
 0x143   :  { %v211_v34 = vadd.f32 %v209_v48, %v98_v50 }
 0x144   :  { %v562_v63 = vmul.f32 0.03125, %v561_v60 }
 0x145   :  { %213 = vst.msk [vmem:[#allocation2] sm:$0xf] %vm61_vm1, %v211_v34 }
 0x146   :  { %564 = vst.msk [vmem:[#allocation11] sm:$0x1] %vm563_vm8, %v562_v63 }
 0x147   :  { %676 = shalt.err (!%p673_p6)
}
 0x148   :  { %s677_s23 = scalar_lea.hbm %s1010_s4, 16 }
 0x149   :  { %p678_p7 = scmp.ne.s32.totalorder %s1010_s4, %s677_s23  ;;  %p681_p8 = scmp.lt.u32.totalorder %s677_s23, %s1010_s4 }
 0x14b   :  { %p683_p9 = pnand %p681_p8, %p678_p7 }
 0x14d   :  { %686 = shalt.err (!%p683_p9)
}
 0x14e   :  { %599 = dma.vmem_to_hbm [thread:$0]  %s597_s18, 16, %s1010_s4, [#allocation8]   ;;  %v565_v9 = vld [vmem:[#allocation2] sm:$0xf]  ;;  %vm572_vm9 = vcmask 11272   ;;  %vm579_vm10 = vcmask 19472  }
 0x14f   :  { %566 = vst.msk [vmem:[%s1009_s3] sm:$0xf] %vm61_vm1, %v565_v9  ;;  %vm586_vm11 = vcmask 27672  }
 0x192   :  { %v570_v5 = vpop.permute.xlu1 %569 }
 0x193   :  { %573 = vst.msk [vmem:[%s1009_s3] sm:$0xf] %vm572_vm9, %v570_v5 }
 0x199   :  { %v577_v25 = vpop.permute.xlu0 %576 }
 0x19a   :  { %580 = vst.msk [vmem:[%s1009_s3] sm:$0xf] %vm579_vm10, %v577_v25 }
 0x19f   :  { %v584_v35 = vpop.permute.xlu1 %583 }
 0x1a0   :  { %587 = vst.msk [vmem:[%s1009_s3] sm:$0xf] %vm586_vm11, %v584_v35 }
 0x1a1   :  { %691 = dma.done.wait [#allocation8], 16  }
 0x1a2   :  { %692 = vsyncadd [#allocation8], 4294967280 }
 0x1a3   :  { %605 = vsyncpa [#allocation7], 1 }
 0x1a4   :  { %606 = vsyncpa [#allocation10], 1 }
 0x1a5   :  { %607 = vsyncpa [#allocation8], 1 }

</bundles_post_ra>
